<compile_context>
chip_gen: v6e
topology: v6e:2x2x1
jax: 0.10.0
libtpu: 0.0.40
codegen_flags: <defaults>
</compile_context>

<pallas_src>
import functools

import numpy as np
import jax
import jax.numpy as jnp
from jax.experimental import pallas as pl
from jax.experimental.pallas import tpu as pltpu


def _make_synthesis_basis_np(n_fft: int) -> np.ndarray:
    """Inverse-DFT synthesis basis for a one-sided spectrum, shape [2, n_fft, F].

    frame[n] = sum_k  Re[k]*c_k*cos(2*pi*k*n/N)  -  Im[k]*c_k*sin(2*pi*k*n/N)
    with c_k = 1/N for k in {0, N/2} and 2/N otherwise.  Built with numpy at
    trace time (no device-side trig).
    basis[0] multiplies the real channel, basis[1] the imaginary channel.
    """
    assert n_fft % 2 == 0, "one-sided basis assumes even n_fft"
    F = n_fft // 2 + 1
    n = np.arange(n_fft, dtype=np.float64)[:, None]        # [n_fft, 1]
    k = np.arange(F, dtype=np.float64)[None, :]             # [1, F]
    ang = 2.0 * np.pi * k * n / float(n_fft)
    scale = np.where((k == 0) | (k == n_fft // 2), 1.0 / n_fft, 2.0 / n_fft)
    cos_b = scale * np.cos(ang)                              # [n_fft, F]
    sin_b = -scale * np.sin(ang)                             # [n_fft, F]
    return np.stack([cos_b, sin_b]).astype(np.float32)       # [2, n_fft, F]


def istdft_layer(X_stdft: jnp.ndarray, n_fft: int = 16, hop: int = 4) -> jnp.ndarray:
    """Pallas implementation of ISTDFT_Layer.forward.

    X_stdft: [B, 2, F, T] float32 (re/im channel, one-sided bins, frames)
    returns: [B, L] float32 waveform, L = (T-1)*hop + n_fft
    """
    B, two, F, T = X_stdft.shape
    assert two == 2 and F == n_fft // 2 + 1, (X_stdft.shape, n_fft)
    assert n_fft % 2 == 0 and n_fft % hop == 0, "overlap-add folding needs n_fft % hop == 0"
    ov = n_fft // hop                    # overlap factor (frames touching one segment)
    S = T + ov - 1                       # number of hop-sized output segments
    L = (T - 1) * hop + n_fft
    assert L == S * hop

    basis = jnp.asarray(_make_synthesis_basis_np(n_fft))     # [2, n_fft, F] f32
    x = X_stdft.astype(jnp.float32)

    # NOTE: one grid step holds a whole [2, F, T] batch slab in VMEM
    # (~2*F*T*4 bytes double-buffered); fine for any realistic T (<~3e5 frames).
    # TODO(synk): a T-tiled variant with an (ov-1)-frame halo DMA would be
    # needed for pathologically long spectrograms.

    def kernel(basis_ref, x_ref, o_ref):
        re = x_ref[0, 0]                                      # [F, T]
        im = x_ref[0, 1]                                      # [F, T]
        # per-frame inverse DFT of all T frames: two skinny MXU matmuls,
        # frame axis T stays in lanes.
        y = (jnp.dot(basis_ref[0], re, preferred_element_type=jnp.float32)
             + jnp.dot(basis_ref[1], im, preferred_element_type=jnp.float32))  # [n_fft, T]
        # fold the hop-size overlap-add with statically shifted slab adds:
        # O[m, s] = sum_j y[j*hop + m, s - j]   (zero outside [0, T))
        if ov > 1:
            z = jnp.zeros((n_fft, ov - 1), jnp.float32)
            ypp = jnp.concatenate([z, y, z], axis=1)          # [n_fft, S + ov - 1]
        else:
            ypp = y
        acc = ypp[0:hop, ov - 1:ov - 1 + S]
        for j in range(1, ov):
            acc = acc + ypp[j * hop:(j + 1) * hop, ov - 1 - j:ov - 1 - j + S]
        o_ref[0] = acc.astype(o_ref.dtype)                    # [hop, S], one slab store

    out = pl.pallas_call(
        kernel,
        out_shape=jax.ShapeDtypeStruct((B, hop, S), jnp.float32),
        grid_spec=pltpu.PrefetchScalarGridSpec(
            num_scalar_prefetch=0,
            grid=(B,),
            in_specs=[
                # constant index_map -> basis stays resident in VMEM across steps
                pl.BlockSpec((2, n_fft, F), lambda b: (0, 0, 0)),
                # one full batch slab per step, native layout, read exactly once
                pl.BlockSpec((1, 2, F, T), lambda b: (b, 0, 0, 0)),
            ],
            out_specs=pl.BlockSpec((1, hop, S), lambda b: (b, 0, 0)),
        ),
        compiler_params=pltpu.CompilerParams(
            dimension_semantics=("parallel",),      # megacore-shard batch rows (v7x)
            vmem_limit_bytes=32 * 1024 * 1024,
        ),
    )(basis, x)

    # [B, hop, S] -> [B, L]   (out[b, s*hop + m] = O[b, m, s]); single small pass.
    return jnp.transpose(out, (0, 2, 1)).reshape(B, S * hop)


def _reference(X_stdft, n_fft, hop):
    """Independent numpy reference: explicit per-bin iDFT + overlap-add loops."""
    X = np.asarray(X_stdft, dtype=np.float64)
    B, _, F, T = X.shape
    N = n_fft
    L = (T - 1) * hop + N
    n = np.arange(N)
    out = np.zeros((B, L))
    for b in range(B):
        for t in range(T):
            frame = np.zeros(N)
            for k in range(F):
                c = 1.0 / N if k in (0, N // 2) else 2.0 / N
                frame += c * (X[b, 0, k, t] * np.cos(2 * np.pi * k * n / N)
                              - X[b, 1, k, t] * np.sin(2 * np.pi * k * n / N))
            out[b, t * hop:t * hop + N] += frame
    return out.astype(np.float32)


if __name__ == "__main__":
    key = jax.random.PRNGKey(0)
    # (B, n_fft, hop, T): tiny default case, a multi-step / non-128-aligned case,
    # and a different-hop (ov=2) case.
    cases = [
        (2, 16, 4, 8),
        (3, 16, 4, 200),
        (2, 16, 8, 37),
    ]
    for (B, n_fft, hop, T) in cases:
        F = n_fft // 2 + 1
        key, sub = jax.random.split(key)
        X_stdft = jax.random.normal(sub, (B, 2, F, T), dtype=jnp.float32)

        fwd = jax.jit(functools.partial(istdft_layer, n_fft=n_fft, hop=hop))
        y = jax.block_until_ready(fwd(X_stdft))

        ref = _reference(X_stdft, n_fft=n_fft, hop=hop)
        assert y.shape == ref.shape, (y.shape, ref.shape)
        np.testing.assert_allclose(np.asarray(y), ref, rtol=1e-4, atol=1e-4)

    print("KERNEL_OK")
</pallas_src>

<mosaic_0001>
module attributes {stable_mosaic.version = 11 : i64} {
  func.func @kernel(%arg0: i32, %arg1: memref<2x16x9xf32, #tpu.memory_space<vmem>>, %arg2: memref<1x2x9x8xf32, #tpu.memory_space<vmem>>, %arg3: memref<1x4x11xf32, #tpu.memory_space<vmem>>) attributes {dimension_semantics = [#tpu.dimension_semantics<parallel>], iteration_bounds = array<i64: 2>, scalar_prefetch = 0 : i64, scratch_operands = 0 : i64, tpu.core_type = #tpu.core_type<tc>, window_params = [{pipeline_mode = #tpu.pipeline_mode<synchronous>, transform_indices = @transform_0, window_bounds = array<i64: 2, 16, 9>}, {transform_indices = @transform_1, window_bounds = array<i64: 1, 2, 9, 8>}, {transform_indices = @transform_2, window_bounds = array<i64: 1, 4, 11>}]} {
    %c0 = arith.constant 0 : index
    %c0_0 = arith.constant 0 : index
    %c0_1 = arith.constant 0 : index
    %c0_2 = arith.constant 0 : index
    %0 = vector.load %arg2[%c0, %c0_0, %c0_1, %c0_2] : memref<1x2x9x8xf32, #tpu.memory_space<vmem>>, vector<1x1x9x8xf32>
    %1 = vector.shape_cast %0 : vector<1x1x9x8xf32> to vector<9x8xf32>
    %c0_3 = arith.constant 0 : index
    %c1 = arith.constant 1 : index
    %c0_4 = arith.constant 0 : index
    %c0_5 = arith.constant 0 : index
    %2 = vector.load %arg2[%c0_3, %c1, %c0_4, %c0_5] : memref<1x2x9x8xf32, #tpu.memory_space<vmem>>, vector<1x1x9x8xf32>
    %3 = vector.shape_cast %2 : vector<1x1x9x8xf32> to vector<9x8xf32>
    %c0_6 = arith.constant 0 : index
    %c0_7 = arith.constant 0 : index
    %c0_8 = arith.constant 0 : index
    %4 = vector.load %arg1[%c0_6, %c0_7, %c0_8] : memref<2x16x9xf32, #tpu.memory_space<vmem>>, vector<1x16x9xf32>
    %5 = vector.shape_cast %4 : vector<1x16x9xf32> to vector<16x9xf32>
    %cst = arith.constant dense<0.000000e+00> : vector<16x8xf32>
    %6 = tpu.matmul %5, %1, %cst {dimension_numbers = #tpu.dot_dimension_numbers<[1], [0], [0], [1], [0, 0, 1, 1], [], []>} : vector<16x9xf32>, vector<9x8xf32>, vector<16x8xf32> -> vector<16x8xf32>
    %c1_9 = arith.constant 1 : index
    %c0_10 = arith.constant 0 : index
    %c0_11 = arith.constant 0 : index
    %7 = vector.load %arg1[%c1_9, %c0_10, %c0_11] : memref<2x16x9xf32, #tpu.memory_space<vmem>>, vector<1x16x9xf32>
    %8 = vector.shape_cast %7 : vector<1x16x9xf32> to vector<16x9xf32>
    %cst_12 = arith.constant dense<0.000000e+00> : vector<16x8xf32>
    %9 = tpu.matmul %8, %3, %cst_12 {dimension_numbers = #tpu.dot_dimension_numbers<[1], [0], [0], [1], [0, 0, 1, 1], [], []>} : vector<16x9xf32>, vector<9x8xf32>, vector<16x8xf32> -> vector<16x8xf32>
    %10 = arith.addf %6, %9 : vector<16x8xf32>
    %cst_13 = arith.constant 0.000000e+00 : f32
    %11 = vector.broadcast %cst_13 : f32 to vector<16x3xf32>
    %12 = tpu.concatenate %11, %10, %11 in 1 : vector<16x3xf32>, vector<16x8xf32>, vector<16x3xf32> -> vector<16x14xf32>
    %13 = vector.extract_strided_slice %12 {offsets = [0, 3], sizes = [4, 11], strides = [1, 1]} : vector<16x14xf32> to vector<4x11xf32>
    %14 = vector.extract_strided_slice %12 {offsets = [4, 2], sizes = [4, 11], strides = [1, 1]} : vector<16x14xf32> to vector<4x11xf32>
    %15 = arith.addf %13, %14 : vector<4x11xf32>
    %16 = vector.extract_strided_slice %12 {offsets = [8, 1], sizes = [4, 11], strides = [1, 1]} : vector<16x14xf32> to vector<4x11xf32>
    %17 = arith.addf %15, %16 : vector<4x11xf32>
    %18 = vector.extract_strided_slice %12 {offsets = [12, 0], sizes = [4, 11], strides = [1, 1]} : vector<16x14xf32> to vector<4x11xf32>
    %19 = arith.addf %17, %18 : vector<4x11xf32>
    %c0_14 = arith.constant 0 : index
    %c0_15 = arith.constant 0 : index
    %c0_16 = arith.constant 0 : index
    %20 = vector.load %arg3[%c0_14, %c0_15, %c0_16] : memref<1x4x11xf32, #tpu.memory_space<vmem>>, vector<1x4x11xf32>
    %21 = vector.shape_cast %20 : vector<1x4x11xf32> to vector<4x11xf32>
    %22 = vector.shape_cast %19 : vector<4x11xf32> to vector<1x4x11xf32>
    tpu.vector_store %arg3[%c0_14, %c0_15, %c0_16], %22 {strides = array<i32>} : memref<1x4x11xf32, #tpu.memory_space<vmem>>, vector<1x4x11xf32>,
    return
  }
  func.func @transform_0(%arg0: i32) -> (i32, i32, i32) {
    %c0_i32 = arith.constant 0 : i32
    %c0_i32_0 = arith.constant 0 : i32
    %c0_i32_1 = arith.constant 0 : i32
    %c0_i32_2 = arith.constant 0 : i32
    return %c0_i32, %c0_i32_0, %c0_i32_1 : i32, i32, i32
  }
  func.func @transform_1(%arg0: i32) -> (i32, i32, i32, i32) {
    %c0_i32 = arith.constant 0 : i32
    %c0_i32_0 = arith.constant 0 : i32
    %c0_i32_1 = arith.constant 0 : i32
    %c0_i32_2 = arith.constant 0 : i32
    return %arg0, %c0_i32, %c0_i32_0, %c0_i32_1 : i32, i32, i32, i32
  }
  func.func @transform_2(%arg0: i32) -> (i32, i32, i32) {
    %c0_i32 = arith.constant 0 : i32
    %c0_i32_0 = arith.constant 0 : i32
    %c0_i32_1 = arith.constant 0 : i32
    return %arg0, %c0_i32, %c0_i32_0 : i32, i32, i32
  }
}

</mosaic_0001>

<bundles_post_ra>
// kernel: istdft_layer.1
= control target key start
LH: loop header
LB: loop body
LE: loop exit
PB: predicated region body
PF: predicated region fallthrough
CT: control target
= control target key end

     0   :  { %s493_s9 = smov 0   ;;  %s530_s0 = inlined_call_operand.vmem [shape: f32[2,16,9], index: 0, kind: input, shape index: {}]   ;;  %s531_s1 = inlined_call_operand.vmem [shape: f32[2,2,9,8], index: 1, kind: input, shape index: {}]   ;;  %s532_s2 = inlined_call_operand.vmem [shape: f32[2,4,11], index: 2, kind: output, shape index: {}]  }
   0x1 LB: > { %s411_s10 = sadd.s32 4294967295, %s472_s9   ;;  %p415_p0 = scmp.ge.s32.totalorder %s472_s9, 1  ;;  %s472_s9 = sphi %s493_s9, %s12_s9  }
   0x2   : > { %p112_p1 = scmp.lt.s32.totalorder %s472_s9, 3 }
   0x4   : > { %p113_p2 = pnand %p415_p0, %p112_p1 }
   0x5   : > { %p133_p3 = scmp.lt.s32.totalorder (!%p113_p2), %s411_s10, 1  ;;  %s474_s23 = smov (!%p113_p2), 3  }
   0x6   : > { %116 = sbr.rel (%p113_p2) target bundleno = 574 (0x23e), region = 28  ;;  %s475_s24 = smov (!%p113_p2), 1  }
   0x7   : > { %s476_s25 = smov (!%p113_p2), 2   ;;  %s477_s26 = smov (!%p113_p2), 125  }
   0xb   : > { %v421_v0 = vld [vmem:[%s530_s0 + $0x10] sm:$0xff]  ;;  %vm152_vm0 = vcmask 72704   ;;  %v147_v1 = vld [vmem:[%s530_s0] sm:$0xff]  ;;  %s534_s10 = smov (!%p133_p3, %s411_s10), 1  ;;  %vm159_vm1 = vcmask 1040384   ;;  %v422_v6 = vld [vmem:[%s530_s0 + $0x18] sm:$0xff] }
   0xc   : > { %444 = vmatprep.mubr.msk.f32.mxu0 %vm152_vm0, %v421_v0  ;;  %451 = vmatprep.mubr.msk.f32.mxu1 %vm152_vm0, %v147_v1  ;;  %s431_s15 = sshll.u32 %s534_s10, 5  ;;  %v148_v7 = vld [vmem:[%s530_s0 + $0x8] sm:$0xff]  ;;  %vm330_vm2 = vcmask 23552   ;;  %vm333_vm3 = vcmask 89088   ;;  %s418_s27 = sshll.u32 %s534_s10, 2  ;;  %vm356_vm4 = vcmask 84992  }
   0xd   : > { %s137_s18 = scalar_lea.vmem %s531_s1, %s431_s15  ;;  %s141_s30 = scalar_lea.vmem %s532_s2, %s418_s27 }
   0xe   : > { %v420_v2 = vld [vmem:[%s137_s18 + $0x18] sm:$0x1]  ;;  %v143_v3 = vld [vmem:[%s137_s18 + $0x8] sm:$0x1]  ;;  %v419_v4 = vld [vmem:[%s137_s18 + $0x10] sm:$0xff] }
   0xf   : > { %440 = vmatprep.subr.msk.mxu0 %vm159_vm1, %v420_v2  ;;  %447 = vmatprep.subr.msk.mxu1 %vm159_vm1, %v143_v3  ;;  %v142_v5 = vld [vmem:[%s137_s18] sm:$0xff] }
  0x10   : > { %441 = vmatpush3.msk.msra.mxu0 %vm159_vm1, %v420_v2  ;;  %448 = vmatpush3.msk.msra.mxu1 %vm159_vm1, %v143_v3 }
  0x11   : > { %442 = vmatprep.subr.mxu0 %v419_v4  ;;  %449 = vmatprep.subr.mxu1 %v142_v5 }
  0x12   : > { %443 = vmatpush3.msra.mxu0 %v419_v4  ;;  %450 = vmatpush3.msra.mxu1 %v142_v5 }
  0x13   : > { %445 = vmatmul.mubr.msk.f32.vlgmr.msra.gmra.mxu0 %vm152_vm0, %v422_v6  ;;  %452 = vmatmul.mubr.msk.f32.vlgmr.msra.gmra.mxu1 %vm152_vm0, %v148_v7 }
  0xd3   : > { %v446_v8 = vpop.f32.mrf.mxu0  ;;  %v453_v9 = vpop.f32.mrf.mxu1 }
  0xd4   : > { %v319_v13 = vadd.f32 %v453_v9, %v446_v8 }
  0xd5   : > { %v229_v10 = vpop.f32.mrf.mxu0  ;;  %v313_v11 = vpop.f32.mrf.mxu1 }
  0xd6   : > { %v314_v12 = vadd.f32 %v313_v11, %v229_v10 }
  0xd8   : > { %324 = vrot.lane.b32.xlu0 %v314_v12, %s474_s23 }
  0xdc   : > { %326 = vrot.lane.b32.xlu0 %v319_v13, %s474_s23 }
 0x14a   : > { %v325_v14 = vpop.permute.xlu0 %324 }
 0x14b   : > { %v331_v15 = vsel %vm330_vm2, 0.0, %v325_v14 }
 0x14c   : > { %v334_v16 = vsel %vm333_vm3, %v331_v15, 0.0 }
 0x14d   : > { %v337_v17 = vrot.slane %v334_v16, 4 }
 0x14e   : > { %v327_v18 = vpop.permute.xlu0 %326 }
 0x14f   : > { %v332_v19 = vsel %vm330_vm2, 0.0, %v327_v18  ;;  %338 = vrot.lane.b32.xlu1 %v337_v17, %s475_s24 }
 0x150   : > { %v335_v20 = vsel %vm333_vm3, %v332_v19, 0.0 }
 0x151   : > { %v347_v21 = vrot.slane %v335_v20, 4 }
 0x153   : > { %343 = vrot.lane.b32.xlu1 %v335_v20, %s476_s25  ;;  %348 = vrot.lane.b32.xlu0 %v347_v21, %s474_s23 }
 0x1c1   : > { %v339_v22 = vpop.permute.xlu1 %338 }
 0x1c2   : > { %v341_v23 = vadd.f32 %v339_v22, %v334_v16 }
 0x1c5   : > { %v344_v24 = vpop.permute.xlu1 %343  ;;  %v349_v26 = vpop.permute.xlu0 %348 }
 0x1c6   : > { %v346_v25 = vadd.f32 %v344_v24, %v341_v23 }
 0x1c8   : > { %v351_v27 = vadd.f32 %v349_v26, %v346_v25 }
 0x1ca   : > { %353 = vrot.lane.b32.xlu1 %v351_v27, %s477_s26 }
 0x23c   : > { %v354_v28 = vpop.permute.xlu1 %353 }
 0x23d   : > { %357 = vst.msk [vmem:[%s141_s30] sm:$0xf] %vm356_vm4, %v354_v28 }
 0x23e PF: > { %s12_s9 = sadd.s32 1, %s472_s9  }
 0x23f   : > { %p9_p4 = scmp.ge.s32.totalorder %s12_s9, 4  }
 0x241   :  { %11 = sbr.rel (!%p9_p4) target bundleno = 1 (0x1), region = 60 }

</bundles_post_ra>
